<compile_context>
chip_gen: v7x
topology: tpu7x:2x2x1
jax: 0.10.0
libtpu: 0.0.40
codegen_flags: <defaults>
</compile_context>

<pallas_src>
import jax
import jax.numpy as jnp
import numpy as np
from jax.experimental import pallas as pl
from jax.experimental.pallas import tpu as pltpu

LANES = 128
# Sub-32-bit dtypes pack along sublanes: one vreg is (8,128) f32 / (16,128)
# bf16 / (32,128) int8-class.  block bytes = block_groups * 4 KiB regardless.
_SUBLANES_FOR_ITEMSIZE = {4: 8, 2: 16, 1: 32}
_EPS = 1e-6


def _nonzero_mask_loss_kernel(x_ref, y_ref, out_ref):
    # Load native-dtype tiles and cast on-chip (keeps HBM traffic minimal).
    x = x_ref[...].astype(jnp.float32)
    y = y_ref[...].astype(jnp.float32)

    # clamp(x + y, max=1.0) + 1e-6
    min_value = jnp.minimum(x + y, jnp.float32(1.0)) + jnp.float32(_EPS)

    # EUP approx reciprocal (frees the VALU slot) + one Newton-Raphson
    # refinement to match the exact f32 divide to ~1 ulp.
    r = pl.reciprocal(min_value, approx=True)
    r = r * (jnp.float32(2.0) - min_value * r)

    # Collapse (block_groups, sublanes, 128) -> one (sublanes, 128) tile of
    # partial sums with plain VPU adds; no cross-lane reduce, no SMEM RMW.
    out_ref[...] = jnp.sum(r, axis=0)


def nonzero_mask_loss(x, y, *, max_block_groups=512):
    """mean(1 / (clamp(x + y, max=1.0) + 1e-6)) over all elements."""
    assert x.shape == y.shape, (x.shape, y.shape)
    n_valid = int(np.prod(x.shape))
    assert n_valid > 0, "empty input"

    # Pick a lane-dense packing for the native dtype; fall back to f32 for
    # dtypes the kernel cannot stream natively (ints, f64, ...).
    if (x.dtype == y.dtype
            and jnp.issubdtype(x.dtype, jnp.floating)
            and np.dtype(x.dtype).itemsize in _SUBLANES_FOR_ITEMSIZE):
        stream_dtype = x.dtype
    else:
        stream_dtype = jnp.float32
        x = x.astype(stream_dtype)
        y = y.astype(stream_dtype)
    sublanes = _SUBLANES_FOR_ITEMSIZE[np.dtype(stream_dtype).itemsize]

    group_elems = sublanes * LANES                       # one vreg worth
    n_groups = -(-n_valid // group_elems)                # ceil
    block_groups = min(max_block_groups, n_groups)       # <= 2 MiB / input / buf
    n_chunks = -(-n_groups // block_groups)
    n_groups_padded = n_chunks * block_groups
    n_total = n_groups_padded * group_elems
    n_pad = n_total - n_valid

    def _prep(a):
        a = jnp.ravel(a)
        if n_pad:
            # Pad with 1.0: 1+1=2 -> clamp -> 1 -> 1/(1+eps); the padded
            # contribution is removed analytically below (no in-kernel mask).
            a = jnp.pad(a, (0, n_pad), constant_values=1.0)
        return a.reshape(n_groups_padded, sublanes, LANES)

    xf = _prep(x)
    yf = _prep(y)

    block = (block_groups, sublanes, LANES)
    partials = pl.pallas_call(
        _nonzero_mask_loss_kernel,
        out_shape=jax.ShapeDtypeStruct((n_chunks * sublanes, LANES), jnp.float32),
        grid=(n_chunks,),
        in_specs=[
            pl.BlockSpec(block, lambda i: (i, 0, 0)),
            pl.BlockSpec(block, lambda i: (i, 0, 0)),
        ],
        out_specs=pl.BlockSpec((sublanes, LANES), lambda i: (i, 0)),
        compiler_params=pltpu.CompilerParams(
            dimension_semantics=("parallel",)),
    )(xf, yf)

    total = jnp.sum(partials)
    if n_pad:
        # Each padded element contributes exactly 1/(1+eps); subtract it.
        pad_contrib = jnp.float32(n_pad) * (
            jnp.float32(1.0) / (jnp.float32(1.0) + jnp.float32(_EPS)))
        total = total - pad_contrib
    return total / jnp.float32(n_valid)


def _reference(x, y):
    """Pure-JAX reference mirroring the PyTorch forward."""
    min_value = jnp.minimum(x.astype(jnp.float32) + y.astype(jnp.float32),
                            1.0) + _EPS
    return jnp.mean(1.0 / min_value)


if __name__ == "__main__":
    key = jax.random.PRNGKey(0)
    kx, ky = jax.random.split(key)
    # Mask-like inputs in [0, 1], NCHW: (B=2, C=4, H=16, W=16).
    x = jax.random.uniform(kx, (2, 4, 16, 16), dtype=jnp.float32)
    y = jax.random.uniform(ky, (2, 4, 16, 16), dtype=jnp.float32)

    loss = jax.block_until_ready(nonzero_mask_loss(x, y))
    ref = jax.block_until_ready(_reference(x, y))

    if not np.allclose(np.asarray(loss), np.asarray(ref), rtol=1e-5, atol=1e-6):
        raise AssertionError(f"mismatch: kernel={loss} ref={ref}")

    print("KERNEL_OK")
</pallas_src>

<mosaic_0001>
module attributes {stable_mosaic.version = 11 : i64} {
  func.func @_nonzero_mask_loss_kernel(%arg0: i32, %arg1: memref<2x8x128xf32, #tpu.memory_space<vmem>>, %arg2: memref<2x8x128xf32, #tpu.memory_space<vmem>>, %arg3: memref<8x128xf32, #tpu.memory_space<vmem>>) attributes {dimension_semantics = [#tpu.dimension_semantics<parallel>], iteration_bounds = array<i64: 1>, scalar_prefetch = 0 : i64, scratch_operands = 0 : i64, tpu.core_type = #tpu.core_type<tc>, window_params = [{transform_indices = @transform_0, window_bounds = array<i64: 2, 8, 128>}, {transform_indices = @transform_1, window_bounds = array<i64: 2, 8, 128>}, {transform_indices = @transform_2, window_bounds = array<i64: 8, 128>}]} {
    %c0 = arith.constant 0 : index
    %c0_0 = arith.constant 0 : index
    %c0_1 = arith.constant 0 : index
    %0 = vector.load %arg1[%c0, %c0_0, %c0_1] : memref<2x8x128xf32, #tpu.memory_space<vmem>>, vector<2x8x128xf32>
    %c0_2 = arith.constant 0 : index
    %c0_3 = arith.constant 0 : index
    %c0_4 = arith.constant 0 : index
    %1 = vector.load %arg2[%c0_2, %c0_3, %c0_4] : memref<2x8x128xf32, #tpu.memory_space<vmem>>, vector<2x8x128xf32>
    %2 = arith.addf %0, %1 : vector<2x8x128xf32>
    %cst = arith.constant 1.000000e+00 : f32
    %3 = vector.broadcast %cst : f32 to vector<2x8x128xf32>
    %4 = arith.minimumf %2, %3 : vector<2x8x128xf32>
    %cst_5 = arith.constant 9.99999997E-7 : f32
    %5 = vector.broadcast %cst_5 : f32 to vector<2x8x128xf32>
    %6 = arith.addf %4, %5 : vector<2x8x128xf32>
    %7 = tpu.reciprocal %6 {approx = true} : vector<2x8x128xf32> -> vector<2x8x128xf32>
    %8 = arith.mulf %6, %7 : vector<2x8x128xf32>
    %cst_6 = arith.constant 2.000000e+00 : f32
    %9 = vector.broadcast %cst_6 : f32 to vector<2x8x128xf32>
    %10 = arith.subf %9, %8 : vector<2x8x128xf32>
    %11 = arith.mulf %7, %10 : vector<2x8x128xf32>
    %cst_7 = arith.constant dense<0.000000e+00> : vector<8x128xf32>
    %12 = vector.multi_reduction <add>, %11, %cst_7 [0] : vector<2x8x128xf32> to vector<8x128xf32>
    %c0_8 = arith.constant 0 : index
    %c0_9 = arith.constant 0 : index
    %13 = vector.load %arg3[%c0_8, %c0_9] : memref<8x128xf32, #tpu.memory_space<vmem>>, vector<8x128xf32>
    tpu.vector_store %arg3[%c0_8, %c0_9], %12 {strides = array<i32>} : memref<8x128xf32, #tpu.memory_space<vmem>>, vector<8x128xf32>,
    return
  }
  func.func @transform_0(%arg0: i32) -> (i32, i32, i32) {
    %c0_i32 = arith.constant 0 : i32
    %c0_i32_0 = arith.constant 0 : i32
    %c0_i32_1 = arith.constant 0 : i32
    return %arg0, %c0_i32, %c0_i32_0 : i32, i32, i32
  }
  func.func @transform_1(%arg0: i32) -> (i32, i32, i32) {
    %c0_i32 = arith.constant 0 : i32
    %c0_i32_0 = arith.constant 0 : i32
    %c0_i32_1 = arith.constant 0 : i32
    return %arg0, %c0_i32, %c0_i32_0 : i32, i32, i32
  }
  func.func @transform_2(%arg0: i32) -> (i32, i32) {
    %c0_i32 = arith.constant 0 : i32
    %c0_i32_0 = arith.constant 0 : i32
    return %arg0, %c0_i32 : i32, i32
  }
}

</mosaic_0001>

<bundles_post_ra>
// kernel: tpu_custom_call.1
= control target key start
LH: loop header
LB: loop body
LE: loop exit
PB: predicated region body
PF: predicated region fallthrough
CT: control target
= control target key end

     0   :  { %7 = vsyncpa [#allocation3], 0  ;;  %s213_s0 = inlined_call_operand.hbm [shape: f32[2,8,128], index: 0, kind: input, shape index: {}]   ;;  %s214_s1 = inlined_call_operand.hbm [shape: f32[2,8,128], index: 1, kind: input, shape index: {}]   ;;  %s215_s2 = inlined_call_operand.hbm [shape: f32[8,128], index: 2, kind: output, shape index: {}]  }
   0x1   :  { %8 = vsyncpa [#allocation6], 0 }
   0x2   :  { %9 = vsyncpa [#allocation4], 0  ;;  %s157_s9 = smov [#allocation2]   ;;  %s85_s13 = scalar_lea.hbm %s213_s0, 256 }
   0x3   :  { %s15_s10 = sshll.u32 %s157_s9, 4  ;;  %p86_p0 = scmp.ne.s32.totalorder %s213_s0, %s85_s13  ;;  %s16_s10 = int_to_ptr.vmem [resolvable:$true] %s15_s10 }
   0x4   :  { %p89_p1 = scmp.lt.u32.totalorder %s85_s13, %s213_s0 }
   0x6   :  { %p91_p2 = pnand %p89_p1, %p86_p0 }
   0x8   :  { %94 = shalt.err (!%p91_p2)
}
   0x9   :  { %s95_s18 = scalar_lea.vmem %s16_s10, 256  ;;  %p100_p4 = scmp.lt.s32.totalorder %s16_s10, %s16_s10 }
   0xa   :  { %p96_p3 = scmp.ne.s32.totalorder %s16_s10, %s95_s18  ;;  %p101_p5 = scmp.lt.s32.totalorder %s95_s18, %s95_s18 }
   0xc   :  { %p102_p6 = por %p101_p5, %p100_p4 }
   0xe   :  { %p103_p7 = pnand %p102_p6, %p96_p3 }
  0x10   :  { %106 = shalt.err (!%p103_p7)
}
  0x11   :  { %s158_s19 = smov 128   ;;  %s159_s20 = smov 8  }
  0x12   :  { %21 = dma.hbm_to_vmem [thread:$0]  %s213_s0, 256, %s16_s10, [#allocation3], %s158_s19, %s158_s19, %s159_s20  }
  0x13   :  { %s160_s23 = smov [#allocation5]   ;;  %s107_s27 = scalar_lea.hbm %s214_s1, 256 }
  0x14   :  { %s27_s24 = sshll.u32 %s160_s23, 4  ;;  %p108_p8 = scmp.ne.s32.totalorder %s214_s1, %s107_s27  ;;  %s28_s24 = int_to_ptr.vmem [resolvable:$true] %s27_s24 }
  0x15   :  { %p111_p9 = scmp.lt.u32.totalorder %s107_s27, %s214_s1 }
  0x17   :  { %p113_p10 = pnand %p111_p9, %p108_p8 }
  0x19   :  { %116 = shalt.err (!%p113_p10)
}
  0x1a   :  { %s117_s4 = scalar_lea.vmem %s28_s24, 256  ;;  %p122_p12 = scmp.lt.s32.totalorder %s28_s24, %s28_s24 }
  0x1b   :  { %p118_p11 = scmp.ne.s32.totalorder %s28_s24, %s117_s4  ;;  %p123_p13 = scmp.lt.s32.totalorder %s117_s4, %s117_s4 }
  0x1d   :  { %p124_p0 = por %p123_p13, %p122_p12 }
  0x1f   :  { %p125_p1 = pnand %p124_p0, %p118_p11 }
  0x21   :  { %128 = shalt.err (!%p125_p1)
}
  0x22   :  { %33 = dma.hbm_to_vmem [thread:$0]  %s214_s1, 256, %s28_s24, [#allocation6], %s158_s19, %s158_s19, %s159_s20  }
  0x23   :  { %151 = dma.done.wait [#allocation3], 256  }
  0x24   :  { %152 = vsyncadd [#allocation3], 4294967040 }
  0x25   :  { %153 = dma.done.wait [#allocation6], 256  }
  0x26   :  { %154 = vsyncadd [#allocation6], 4294967040  ;;  %v40_v0 = vld [vmem:[#allocation2] sm:$0xff]  ;;  %v41_v1 = vld [vmem:[#allocation2 + $0x8] sm:$0xff]  ;;  %s161_s1 = smov [#allocation7]  }
  0x27   :  { %v42_v2 = vld [vmem:[#allocation5] sm:$0xff]  ;;  %v43_v3 = vld [vmem:[#allocation5 + $0x8] sm:$0xff]  ;;  %s66_s6 = sshll.u32 %s161_s1, 4  ;;  %s67_s6 = int_to_ptr.vmem [resolvable:$true] %s66_s6 }
  0x28   :  { %v44_v4 = vadd.f32 %v42_v2, %v40_v0  ;;  %v45_v5 = vadd.f32 %v43_v3, %v41_v1  ;;  %s129_s7 = scalar_lea.vmem %s67_s6, 128  ;;  %p134_p3 = scmp.lt.s32.totalorder %s67_s6, %s67_s6 }
  0x29   :  { %p130_p2 = scmp.ne.s32.totalorder %s67_s6, %s129_s7  ;;  %p135_p4 = scmp.lt.s32.totalorder %s129_s7, %s129_s7 }
  0x2a   :  { %v46_v6 = vmin.f32 %v44_v4, 1.0  ;;  %v47_v7 = vmin.f32 %v45_v5, 1.0 }
  0x2b   :  { %p136_p5 = por %p135_p4, %p134_p3 }
  0x2c   :  { %v48_v8 = vadd.f32 1e-06, %v46_v6  ;;  %v49_v9 = vadd.f32 1e-06, %v47_v7 }
  0x2d   :  { %p137_p6 = pnand %p136_p5, %p130_p2 }
  0x2e   :  { %81 = vrcp.f32 %v48_v8 }
  0x2f   :  { %83 = vrcp.f32 %v49_v9 }
  0x38   :  { %v82_v10 = vpop.eup %81 }
  0x39   :  { %v84_v11 = vpop.eup %83  ;;  %v52_v12 = vmul.f32 %v82_v10, %v48_v8 }
  0x3a   :  { %v53_v13 = vmul.f32 %v84_v11, %v49_v9 }
  0x3b   :  { %v54_v14 = vsub.f32 2.0, %v52_v12 }
  0x3c   :  { %v55_v15 = vsub.f32 2.0, %v53_v13 }
  0x3d   :  { %v56_v16 = vmul.f32 %v82_v10, %v54_v14 }
  0x3e   :  { %v57_v17 = vmul.f32 %v84_v11, %v55_v15 }
  0x40   :  { %v58_v18 = vadd.f32 %v57_v17, %v56_v16 }
  0x42   :  { %59 = vst [vmem:[#allocation7] sm:$0xff] %v58_v18 }
  0x43   :  { %140 = shalt.err (!%p137_p6)
}
  0x44   :  { %s141_s10 = scalar_lea.hbm %s215_s2, 128 }
  0x45   :  { %p142_p7 = scmp.ne.s32.totalorder %s215_s2, %s141_s10  ;;  %p145_p8 = scmp.lt.u32.totalorder %s141_s10, %s215_s2 }
  0x47   :  { %p147_p9 = pnand %p145_p8, %p142_p7 }
  0x49   :  { %150 = shalt.err (!%p147_p9)
}
  0x4a   :  { %69 = dma.vmem_to_hbm [thread:$0]  %s67_s6, 128, %s215_s2, [#allocation4]  }
  0x4b   :  { %155 = dma.done.wait [#allocation4], 128  }
  0x4c   :  { %156 = vsyncadd [#allocation4], 4294967168 }
  0x4d   :  { %73 = vsyncpa [#allocation3], 1 }
  0x4e   :  { %74 = vsyncpa [#allocation6], 1 }
  0x4f   :  { %75 = vsyncpa [#allocation4], 1 }

</bundles_post_ra>
